<compile_context>
chip_gen: v5e
topology: v5e:2x2
jax: 0.10.0
libtpu: 0.0.40
codegen_flags: <defaults>
</compile_context>

<pallas_src>
import functools

import jax
import jax.numpy as jnp
from jax.experimental import pallas as pl
from jax.experimental.pallas import tpu as pltpu

LANE = 128             # vreg lane width
MAX_BLOCK_ROWS = 4096  # (4096, 128) f32 = 2 MiB / input / buffer -> 12 MiB total


def _round_up(x, m):
    return ((x + m - 1) // m) * m


def _reduce_kernel(old_ref, new_ref, orig_ref, dot_ref, xsq_ref, ysq_ref,
                   *, block_rows, chunks_per_split, valid_rows, two_split,
                   has_tail):
    if two_split:
        s = pl.program_id(0)           # split index (one per TensorCore, v7x)
        c = pl.program_id(1)           # chunk index within split ("arbitrary")
    else:
        s = 0
        c = pl.program_id(0)

    # Per-split resident accumulators: init on the first chunk of each split.
    @pl.when(c == 0)
    def _init():
        dot_ref[...] = jnp.zeros_like(dot_ref)
        xsq_ref[...] = jnp.zeros_like(xsq_ref)
        ysq_ref[...] = jnp.zeros_like(ysq_ref)

    n8 = block_rows // 8

    def accumulate(x, y):
        # vreg-aligned partial reduction (block_rows,128) -> (8,128): pure VALU
        # adds (no XLU), hides under the HBM-bound input stream.  Keep exactly
        # this structure (no MXU tricks, no deeper buffering).
        dot_ref[...] += jnp.sum((x * y).reshape(n8, 8, LANE), axis=0)
        xsq_ref[...] += jnp.sum((x * x).reshape(n8, 8, LANE), axis=0)
        ysq_ref[...] += jnp.sum((y * y).reshape(n8, 8, LANE), axis=0)

    def fast_body():
        # Full interior block: no mask work at all.
        o = orig_ref[...].astype(jnp.float32)
        x = old_ref[...].astype(jnp.float32) - o
        y = new_ref[...].astype(jnp.float32) - o
        accumulate(x, y)

    if not has_tail:
        # Statically known: every chunk is full and there are no clamped
        # duplicate chunks -> compile only the fast path.
        fast_body()
        return

    # Logical (unclamped) chunk index -> global row offset of this block.
    chunk = s * chunks_per_split + c
    row0 = chunk * block_rows
    full = row0 + block_rows <= valid_rows

    @pl.when(full)
    def _fast():
        fast_body()

    @pl.when(jnp.logical_not(full))
    def _masked():
        # Masks (a) the partial tail block and (b) duplicate clamped blocks of
        # an over-provisioned split.  `valid_rows` is a compile-time constant.
        row_ids = row0 + jax.lax.broadcasted_iota(
            jnp.int32, (block_rows, LANE), 0)
        valid = row_ids < valid_rows
        o = orig_ref[...].astype(jnp.float32)
        # Keep the mask as a SELECT (never a multiply): out-of-range rows may
        # contain NaN/Inf garbage read past the logical end of the slab.
        x = jnp.where(valid, old_ref[...].astype(jnp.float32) - o, 0.0)
        y = jnp.where(valid, new_ref[...].astype(jnp.float32) - o, 0.0)
        accumulate(x, y)


def _to_slab(a):
    flat = a.reshape(-1)
    n = flat.shape[0]
    rem = n % LANE
    if rem:
        # Rare slow path (n not lane-aligned): pad costs an extra HBM copy.
        # TODO(synk): handle the <128-element ragged tail outside the kernel to
        # avoid this copy for non-lane-aligned feature maps.
        flat = jnp.pad(flat, (0, LANE - rem))
    return flat.reshape(-1, LANE)   # reshape of a contiguous array: free


def _device_is_v7():
    try:
        return "v7" in jax.devices()[0].device_kind.lower()
    except Exception:
        return False


@jax.jit
def mid_layer_target_loss(old_attack_mid, new_mid, original_mid, coeff):
    """Mid-layer target loss. Pass inputs in their native dtype (do NOT pre-cast
    to f32): the kernel is HBM-bandwidth bound and upcasts in-register."""
    a = _to_slab(old_attack_mid)
    b = _to_slab(new_mid)
    c = _to_slab(original_mid)

    rows = a.shape[0]
    # Multiple of 16 keeps the block legal for f32 and bf16 inputs.
    block_rows = min(MAX_BLOCK_ROWS, _round_up(rows, 16))
    chunks_total = -(-rows // block_rows)

    # Shard rows across the two TensorCores only where they exist (v7x) and
    # only when there is more than one chunk of work.  On single-TC v5e/v6e a
    # split axis is just a serial loop + an extra accumulator flush, so drop it.
    core_parallel = getattr(pltpu, "CORE_PARALLEL", None)
    two_split = bool(_device_is_v7() and chunks_total >= 2
                     and core_parallel is not None)
    nsplit = 2 if two_split else 1
    cps = -(-chunks_total // nsplit)          # chunks per split

    # Static: does any chunk need the masked tail path?
    has_tail = (rows % block_rows != 0) or (nsplit * cps != chunks_total)

    kernel = functools.partial(
        _reduce_kernel,
        block_rows=block_rows, chunks_per_split=cps, valid_rows=rows,
        two_split=two_split, has_tail=has_tail)

    if two_split:
        grid = (nsplit, cps)

        def in_index(s, c_):
            # Clamp: a split asked for more chunks than exist re-reads the last
            # block; the in-kernel row mask zeroes its contribution.
            return (jnp.minimum(s * cps + c_, chunks_total - 1), 0)

        def out_index(s, c_):
            return (s, 0)

        dim_sem = (core_parallel, pltpu.ARBITRARY)
    else:
        grid = (cps,)

        def in_index(c_):
            return (c_, 0)

        def out_index(c_):
            return (0, 0)

        dim_sem = (pltpu.ARBITRARY,)

    in_spec = pl.BlockSpec((block_rows, LANE), in_index)
    acc_spec = pl.BlockSpec((8, LANE), out_index)
    out_sd = jax.ShapeDtypeStruct((nsplit * 8, LANE), jnp.float32)

    # Advisory cost hint: pure streaming reduction (~8 flops/elem, 0 transc.).
    itemsize = int(jnp.dtype(a.dtype).itemsize)
    cost = pl.CostEstimate(
        flops=8 * int(a.size),
        transcendentals=0,
        bytes_accessed=3 * int(a.size) * itemsize + 3 * nsplit * 8 * LANE * 4)

    dot_s, xsq_s, ysq_s = pl.pallas_call(
        kernel,
        out_shape=(out_sd, out_sd, out_sd),
        grid_spec=pltpu.PrefetchScalarGridSpec(
            num_scalar_prefetch=0,
            grid=grid,
            in_specs=[in_spec, in_spec, in_spec],
            out_specs=(acc_spec, acc_spec, acc_spec),
        ),
        compiler_params=pltpu.CompilerParams(
            dimension_semantics=dim_sem,
            vmem_limit_bytes=32 * 1024 * 1024),
        cost_estimate=cost,
    )(a, b, c)

    # Tiny fused glue: sum the (nsplit*8, 128) partials and combine scalars.
    dot = jnp.sum(dot_s)
    xsq = jnp.sum(xsq_s)
    ysq = jnp.sum(ysq_s)

    x_norm = jnp.sqrt(xsq)
    y_norm = jnp.sqrt(ysq)

    # Reference branches on (y == 0).all(); ysq == 0 is equivalent except when
    # every y is subnormal and its square flushes to zero (reference -> NaN,
    # here -> angle 0).  Keep the guard as a select so no spurious NaNs leak.
    y_is_zero = ysq == 0.0
    angle_loss = jnp.where(
        y_is_zero, 0.0, dot / jnp.where(y_is_zero, 1.0, x_norm * y_norm))
    # If x is identically zero this is inf/nan, matching the reference.
    magnitude_gain = y_norm / x_norm

    out = angle_loss + magnitude_gain * jnp.asarray(coeff, jnp.float32)
    return out.reshape(1, 1)


def _reference(old_attack_mid, new_mid, original_mid, coeff):
    x = (old_attack_mid - original_mid).reshape(1, -1).astype(jnp.float32)
    y = (new_mid - original_mid).reshape(1, -1).astype(jnp.float32)
    xn = jnp.linalg.norm(x)
    yn = jnp.linalg.norm(y)
    y_norm = jnp.where(jnp.all(y == 0), y, y / yn)
    angle = (x / xn) @ y_norm.T
    return angle + (yn / xn) * coeff


if __name__ == "__main__":
    key = jax.random.PRNGKey(0)
    k1, k2, k3 = jax.random.split(key, 3)
    shape = (2, 4, 16, 16)  # small NCHW mid-layer feature map
    old_attack_mid = jax.random.normal(k1, shape, dtype=jnp.float32)
    new_mid = jax.random.normal(k2, shape, dtype=jnp.float32)
    original_mid = jax.random.normal(k3, shape, dtype=jnp.float32)
    coeff = 0.5

    out = mid_layer_target_loss(old_attack_mid, new_mid, original_mid, coeff)
    out = jax.block_until_ready(out)

    ref = _reference(old_attack_mid, new_mid, original_mid, coeff)
    assert out.shape == (1, 1)
    assert jnp.allclose(out, ref, rtol=1e-5, atol=1e-5), (out, ref)

    print("KERNEL_OK")
</pallas_src>

<mosaic_0001>
module attributes {stable_mosaic.version = 11 : i64} {
  func.func @_reduce_kernel(%arg0: i32, %arg1: memref<16x128xf32, #tpu.memory_space<vmem>>, %arg2: memref<16x128xf32, #tpu.memory_space<vmem>>, %arg3: memref<16x128xf32, #tpu.memory_space<vmem>>, %arg4: memref<8x128xf32, #tpu.memory_space<vmem>>, %arg5: memref<8x128xf32, #tpu.memory_space<vmem>>, %arg6: memref<8x128xf32, #tpu.memory_space<vmem>>) attributes {dimension_semantics = [#tpu.dimension_semantics<arbitrary>], iteration_bounds = array<i64: 1>, scalar_prefetch = 0 : i64, scratch_operands = 0 : i64, tpu.core_type = #tpu.core_type<tc>, window_params = [{transform_indices = @transform_0, window_bounds = array<i64: 16, 128>}, {transform_indices = @transform_1, window_bounds = array<i64: 16, 128>}, {transform_indices = @transform_2, window_bounds = array<i64: 16, 128>}, {pipeline_mode = #tpu.pipeline_mode<synchronous>, transform_indices = @transform_3, window_bounds = array<i64: 8, 128>}, {pipeline_mode = #tpu.pipeline_mode<synchronous>, transform_indices = @transform_4, window_bounds = array<i64: 8, 128>}, {pipeline_mode = #tpu.pipeline_mode<synchronous>, transform_indices = @transform_5, window_bounds = array<i64: 8, 128>}]} {
    %c0_i32 = arith.constant 0 : i32
    %0 = arith.cmpi eq, %arg0, %c0_i32 : i32
    %1 = arith.extui %0 : i1 to i32
    %c0_i32_0 = arith.constant 0 : i32
    %2 = arith.cmpi ne, %1, %c0_i32_0 : i32
    scf.if %2 {
      %cst_20 = arith.constant 0.000000e+00 : f32
      %26 = vector.broadcast %cst_20 : f32 to vector<8x128xf32>
      %c0_21 = arith.constant 0 : index
      %c0_22 = arith.constant 0 : index
      %27 = vector.load %arg4[%c0_21, %c0_22] : memref<8x128xf32, #tpu.memory_space<vmem>>, vector<8x128xf32>
      tpu.vector_store %arg4[%c0_21, %c0_22], %26 {strides = array<i32>} : memref<8x128xf32, #tpu.memory_space<vmem>>, vector<8x128xf32>,
      %cst_23 = arith.constant 0.000000e+00 : f32
      %28 = vector.broadcast %cst_23 : f32 to vector<8x128xf32>
      %c0_24 = arith.constant 0 : index
      %c0_25 = arith.constant 0 : index
      %29 = vector.load %arg5[%c0_24, %c0_25] : memref<8x128xf32, #tpu.memory_space<vmem>>, vector<8x128xf32>
      tpu.vector_store %arg5[%c0_24, %c0_25], %28 {strides = array<i32>} : memref<8x128xf32, #tpu.memory_space<vmem>>, vector<8x128xf32>,
      %cst_26 = arith.constant 0.000000e+00 : f32
      %30 = vector.broadcast %cst_26 : f32 to vector<8x128xf32>
      %c0_27 = arith.constant 0 : index
      %c0_28 = arith.constant 0 : index
      %31 = vector.load %arg6[%c0_27, %c0_28] : memref<8x128xf32, #tpu.memory_space<vmem>>, vector<8x128xf32>
      tpu.vector_store %arg6[%c0_27, %c0_28], %30 {strides = array<i32>} : memref<8x128xf32, #tpu.memory_space<vmem>>, vector<8x128xf32>,
    } else {
    }
    %c0 = arith.constant 0 : index
    %c0_1 = arith.constant 0 : index
    %3 = vector.load %arg3[%c0, %c0_1] : memref<16x128xf32, #tpu.memory_space<vmem>>, vector<16x128xf32>
    %c0_2 = arith.constant 0 : index
    %c0_3 = arith.constant 0 : index
    %4 = vector.load %arg1[%c0_2, %c0_3] : memref<16x128xf32, #tpu.memory_space<vmem>>, vector<16x128xf32>
    %5 = arith.subf %4, %3 : vector<16x128xf32>
    %c0_4 = arith.constant 0 : index
    %c0_5 = arith.constant 0 : index
    %6 = vector.load %arg2[%c0_4, %c0_5] : memref<16x128xf32, #tpu.memory_space<vmem>>, vector<16x128xf32>
    %7 = arith.subf %6, %3 : vector<16x128xf32>
    %c0_6 = arith.constant 0 : index
    %c0_7 = arith.constant 0 : index
    %8 = vector.load %arg4[%c0_6, %c0_7] : memref<8x128xf32, #tpu.memory_space<vmem>>, vector<8x128xf32>
    %9 = arith.mulf %5, %7 : vector<16x128xf32>
    %10 = vector.shape_cast %9 : vector<16x128xf32> to vector<2x8x128xf32>
    %cst = arith.constant dense<0.000000e+00> : vector<8x128xf32>
    %11 = vector.multi_reduction <add>, %10, %cst [0] : vector<2x8x128xf32> to vector<8x128xf32>
    %12 = arith.addf %8, %11 : vector<8x128xf32>
    %c0_8 = arith.constant 0 : index
    %c0_9 = arith.constant 0 : index
    %13 = vector.load %arg4[%c0_8, %c0_9] : memref<8x128xf32, #tpu.memory_space<vmem>>, vector<8x128xf32>
    tpu.vector_store %arg4[%c0_8, %c0_9], %12 {strides = array<i32>} : memref<8x128xf32, #tpu.memory_space<vmem>>, vector<8x128xf32>,
    %c0_10 = arith.constant 0 : index
    %c0_11 = arith.constant 0 : index
    %14 = vector.load %arg5[%c0_10, %c0_11] : memref<8x128xf32, #tpu.memory_space<vmem>>, vector<8x128xf32>
    %15 = arith.mulf %5, %5 : vector<16x128xf32>
    %16 = vector.shape_cast %15 : vector<16x128xf32> to vector<2x8x128xf32>
    %cst_12 = arith.constant dense<0.000000e+00> : vector<8x128xf32>
    %17 = vector.multi_reduction <add>, %16, %cst_12 [0] : vector<2x8x128xf32> to vector<8x128xf32>
    %18 = arith.addf %14, %17 : vector<8x128xf32>
    %c0_13 = arith.constant 0 : index
    %c0_14 = arith.constant 0 : index
    %19 = vector.load %arg5[%c0_13, %c0_14] : memref<8x128xf32, #tpu.memory_space<vmem>>, vector<8x128xf32>
    tpu.vector_store %arg5[%c0_13, %c0_14], %18 {strides = array<i32>} : memref<8x128xf32, #tpu.memory_space<vmem>>, vector<8x128xf32>,
    %c0_15 = arith.constant 0 : index
    %c0_16 = arith.constant 0 : index
    %20 = vector.load %arg6[%c0_15, %c0_16] : memref<8x128xf32, #tpu.memory_space<vmem>>, vector<8x128xf32>
    %21 = arith.mulf %7, %7 : vector<16x128xf32>
    %22 = vector.shape_cast %21 : vector<16x128xf32> to vector<2x8x128xf32>
    %cst_17 = arith.constant dense<0.000000e+00> : vector<8x128xf32>
    %23 = vector.multi_reduction <add>, %22, %cst_17 [0] : vector<2x8x128xf32> to vector<8x128xf32>
    %24 = arith.addf %20, %23 : vector<8x128xf32>
    %c0_18 = arith.constant 0 : index
    %c0_19 = arith.constant 0 : index
    %25 = vector.load %arg6[%c0_18, %c0_19] : memref<8x128xf32, #tpu.memory_space<vmem>>, vector<8x128xf32>
    tpu.vector_store %arg6[%c0_18, %c0_19], %24 {strides = array<i32>} : memref<8x128xf32, #tpu.memory_space<vmem>>, vector<8x128xf32>,
    return
  }
  func.func @transform_0(%arg0: i32) -> (i32, i32) {
    %c0_i32 = arith.constant 0 : i32
    %c0_i32_0 = arith.constant 0 : i32
    return %arg0, %c0_i32 : i32, i32
  }
  func.func @transform_1(%arg0: i32) -> (i32, i32) {
    %c0_i32 = arith.constant 0 : i32
    %c0_i32_0 = arith.constant 0 : i32
    return %arg0, %c0_i32 : i32, i32
  }
  func.func @transform_2(%arg0: i32) -> (i32, i32) {
    %c0_i32 = arith.constant 0 : i32
    %c0_i32_0 = arith.constant 0 : i32
    return %arg0, %c0_i32 : i32, i32
  }
  func.func @transform_3(%arg0: i32) -> (i32, i32) {
    %c0_i32 = arith.constant 0 : i32
    %c0_i32_0 = arith.constant 0 : i32
    %c0_i32_1 = arith.constant 0 : i32
    return %c0_i32, %c0_i32_0 : i32, i32
  }
  func.func @transform_4(%arg0: i32) -> (i32, i32) {
    %c0_i32 = arith.constant 0 : i32
    %c0_i32_0 = arith.constant 0 : i32
    %c0_i32_1 = arith.constant 0 : i32
    return %c0_i32, %c0_i32_0 : i32, i32
  }
  func.func @transform_5(%arg0: i32) -> (i32, i32) {
    %c0_i32 = arith.constant 0 : i32
    %c0_i32_0 = arith.constant 0 : i32
    %c0_i32_1 = arith.constant 0 : i32
    return %c0_i32, %c0_i32_0 : i32, i32
  }
}

</mosaic_0001>

<bundles_post_ra>
// kernel: mid_layer_target_loss.1
= control target key start
LH: loop header
LB: loop body
LE: loop exit
PB: predicated region body
PF: predicated region fallthrough
CT: control target
= control target key end

     0   :  { %s122_s0 = inlined_call_operand.vmem [shape: f32[16,128], index: 0, kind: input, shape index: {}]   ;;  %s123_s1 = inlined_call_operand.vmem [shape: f32[16,128], index: 1, kind: input, shape index: {}]   ;;  %s124_s2 = inlined_call_operand.vmem [shape: f32[16,128], index: 2, kind: input, shape index: {}]   ;;  %s125_s3 = inlined_call_operand.vmem [shape: f32[8,128], index: 3, kind: output, shape index: {0}]   ;;  %s126_s4 = inlined_call_operand.vmem [shape: f32[8,128], index: 4, kind: output, shape index: {1}]   ;;  %s127_s5 = inlined_call_operand.vmem [shape: f32[8,128], index: 5, kind: output, shape index: {2}]  }
   0x1   :  { %v24_v0 = vld [vmem:[%s124_s2] sm:$0xff]  ;;  %v25_v1 = vld [vmem:[%s124_s2 + $0x8] sm:$0xff] }
   0x2   :  { %v26_v2 = vld [vmem:[%s122_s0] sm:$0xff]  ;;  %v27_v3 = vld [vmem:[%s122_s0 + $0x8] sm:$0xff] }
   0x3   :  { %v28_v4 = vsub.f32 %v26_v2, %v24_v0  ;;  %v30_v5 = vld [vmem:[%s123_s1] sm:$0xff]  ;;  %v31_v6 = vld [vmem:[%s123_s1 + $0x8] sm:$0xff]  ;;  %v29_v7 = vsub.f32 %v27_v3, %v25_v1 }
   0x4   :  { %v32_v8 = vsub.f32 %v30_v5, %v24_v0  ;;  %v33_v9 = vsub.f32 %v31_v6, %v25_v1 }
   0x5   :  { %v41_v10 = vmul.f32 %v28_v4, %v28_v4  ;;  %v42_v13 = vmul.f32 %v29_v7, %v29_v7 }
   0x6   :  { %v35_v11 = vmul.f32 %v32_v8, %v28_v4  ;;  %v36_v12 = vmul.f32 %v33_v9, %v29_v7  ;;  %v47_v14 = vmul.f32 %v32_v8, %v32_v8  ;;  %v48_v15 = vmul.f32 %v33_v9, %v33_v9 }
   0x7   :  { %v43_v17 = vadd.f32 %v42_v13, %v41_v10 }
   0x8   :  { %v37_v16 = vadd.f32 %v36_v12, %v35_v11  ;;  %v49_v18 = vadd.f32 %v48_v15, %v47_v14 }
   0x9   :  { %45 = vst [vmem:[%s126_s4] sm:$0xff] %v43_v17 }
   0xa   :  { %39 = vst [vmem:[%s125_s3] sm:$0xff] %v37_v16 }
   0xb   :  { %51 = vst [vmem:[%s127_s5] sm:$0xff] %v49_v18 }

</bundles_post_ra>
